<compile_context>
chip_gen: v7x
topology: tpu7x:2x2x1
jax: 0.10.0
libtpu: 0.0.40
codegen_flags: <defaults>
</compile_context>

<pallas_src>
import functools

import jax
import jax.numpy as jnp
from jax.experimental import pallas as pl
from jax.experimental.pallas import tpu as pltpu

IN_FEATURES = 5
HIDDEN = 10
OUT_FEATURES = 5

# Per-step batch-tile target (lanes). 64K lanes -> ~2.5 MiB HBM traffic per
# grid step, so the ~0.35 us fixed per-step overhead is <10% of step DMA time
# on every generation, while VMEM stays ~16-24 MiB including temporaries.
DEFAULT_TILE_B = 64 * 1024


def _net2_kernel(wt_ref, be_ref, xT_ref, oT_ref):
    """Fused linear_3(linear_1(x)) on one (5, TILE_B) feature-major tile.

    wt_ref: (5, 5)       fused W_eff (out, in)  -- VMEM-resident
    be_ref: (5, 1)       fused bias             -- VMEM-resident
    xT_ref: (5, TILE_B)  x^T tile (features on sublanes, batch on lanes)
    oT_ref: (5, TILE_B)  y^T tile
    """
    x = xT_ref[...]                                     # (5, TB) f32
    wt = wt_ref[...]                                    # (5, 5)
    acc = jnp.broadcast_to(be_ref[...], oT_ref.shape)   # bias, (5, TB)
    # K = 5 contraction as unrolled VPU broadcast-FMAs; hidden under the DMA
    # stream of this memory-bound kernel (MXU would be <2% utilized).
    for k in range(IN_FEATURES):
        acc = acc + wt[:, k:k + 1] * x[k:k + 1, :]      # outer-product FMA
    oT_ref[...] = acc.astype(oT_ref.dtype)


def fuse_params(w1, b1, w3, b3):
    """Precompute fused (5,5) weight and (5,1) bias once, outside the hot path."""
    wt = (w3 @ w1).astype(jnp.float32)                   # (5, 5)  (out, in)
    be = (w3 @ b1 + b3).reshape(OUT_FEATURES, 1).astype(jnp.float32)
    return wt, be


def _choose_tile_b(batch, desired=DEFAULT_TILE_B, min_steps=4):
    """Pick a lane-tile: multiple of 128, <= desired, >= min_steps grid steps.

    Targets an even number of steps (>= 4) so v7x's two TensorCores both
    stream, while keeping each step's DMA large enough to amortize the fixed
    per-step pipeline overhead.
    """
    steps = max(min_steps, 2 * pl.cdiv(batch, desired))   # even target
    tile = pl.cdiv(batch, steps)
    tile = max(128, ((tile + 127) // 128) * 128)           # round up to 128
    return min(tile, desired)


def net2_forward_fused(xT, wt, be, *, tile_b_desired=DEFAULT_TILE_B, x_buffers=2):
    """Feature-major forward: xT (5, B) float32 -> yT (5, B).

    Preferred entry point: no transpose / pad / slice passes in HBM.
    wt/be come from fuse_params().
    """
    F, B = xT.shape
    assert F == IN_FEATURES
    tile_b = _choose_tile_b(B, tile_b_desired)
    num_tiles = pl.cdiv(B, tile_b)                       # last tile may be partial

    x_spec_kwargs = {}
    if x_buffers != 2:                                   # optional deeper pipelining
        x_spec_kwargs["pipeline_mode"] = pl.Buffered(x_buffers)

    # Explicit scoped-VMEM budget: double-buffered in+out tiles (5->8 sublane
    # padding => ~128 B/lane) plus whole-tile kernel temporaries, capped below
    # v7x's 64 MiB/TC physical VMEM.
    vmem_limit = int(min(48 * 2**20, max(32 * 2**20, 256 * tile_b + (2 << 20))))

    yT = pl.pallas_call(
        _net2_kernel,
        out_shape=jax.ShapeDtypeStruct((OUT_FEATURES, B), xT.dtype),
        grid=(num_tiles,),
        in_specs=[
            pl.BlockSpec((OUT_FEATURES, IN_FEATURES), lambda i: (0, 0)),
            pl.BlockSpec((OUT_FEATURES, 1), lambda i: (0, 0)),
            pl.BlockSpec((IN_FEATURES, tile_b), lambda i: (0, i), **x_spec_kwargs),
        ],
        out_specs=pl.BlockSpec((OUT_FEATURES, tile_b), lambda i: (0, i)),
        compiler_params=pltpu.CompilerParams(
            dimension_semantics=("parallel",),
            vmem_limit_bytes=vmem_limit,
        ),
        cost_estimate=pl.CostEstimate(
            flops=2 * IN_FEATURES * OUT_FEATURES * B,
            transcendentals=0,
            bytes_accessed=4 * (IN_FEATURES + OUT_FEATURES) * B
            + 4 * (OUT_FEATURES * IN_FEATURES + OUT_FEATURES),
        ),
    )(wt, be, xT)

    return yT                                            # (5, B) feature-major


def net2_forward(x, w1, b1, w3, b3, *, tile_b_desired=DEFAULT_TILE_B):
    """Batch-major convenience wrapper: x (B, 5) -> y (B, 5).

    NOTE: the x.T / y.T round-trips add two extra HBM passes on a memory-bound
    op; prefer keeping activations feature-major and calling
    net2_forward_fused directly.
    """
    wt, be = fuse_params(w1, b1, w3, b3)
    return net2_forward_fused(x.T, wt, be, tile_b_desired=tile_b_desired).T


def init_params(key):
    """Deterministic init mimicking torch.nn.Linear defaults (U[-1/sqrt(fan_in), +])."""
    k1, k2, k3, k4 = jax.random.split(key, 4)
    bound1 = 1.0 / jnp.sqrt(5.0)
    bound3 = 1.0 / jnp.sqrt(10.0)
    w1 = jax.random.uniform(k1, (HIDDEN, IN_FEATURES), jnp.float32, -bound1, bound1)
    b1 = jax.random.uniform(k2, (HIDDEN,), jnp.float32, -bound1, bound1)
    w3 = jax.random.uniform(k3, (OUT_FEATURES, HIDDEN), jnp.float32, -bound3, bound3)
    b3 = jax.random.uniform(k4, (OUT_FEATURES,), jnp.float32, -bound3, bound3)
    return w1, b1, w3, b3


if __name__ == "__main__":
    key = jax.random.PRNGKey(0)
    k_x, k_p = jax.random.split(key)

    # Small, module-consistent shapes. B is a non-multiple of the chosen tile
    # so the masked partial-tail block and a 4-step grid are both exercised
    # (tile selection yields tile_b=256, grid=4 for B=1000).
    B = 1000
    xT = jax.random.normal(k_x, (IN_FEATURES, B), jnp.float32)   # feature-major (5, B)
    w1, b1, w3, b3 = init_params(k_p)

    # Fuse the two linear layers once, outside the per-call hot path.
    wt, be = fuse_params(w1, b1, w3, b3)

    fwd = jax.jit(functools.partial(net2_forward_fused))
    yT = fwd(xT, wt, be)                                          # (5, B) feature-major
    jax.block_until_ready(yT)

    # Reference: unfused two-matmul path in the module's native (B, 5) layout.
    x_bm = xT.T                                                   # (B, 5)
    ref = (x_bm @ w1.T + b1) @ w3.T + b3
    assert yT.shape == (OUT_FEATURES, B)
    assert jnp.allclose(yT.T, ref, atol=1e-5, rtol=1e-5), float(
        jnp.max(jnp.abs(yT.T - ref)))

    # Batch-major compatibility wrapper (adds transpose passes; demo only).
    y_bm = jax.jit(net2_forward)(x_bm, w1, b1, w3, b3)
    jax.block_until_ready(y_bm)
    assert y_bm.shape == (B, OUT_FEATURES)
    assert jnp.allclose(y_bm, ref, atol=1e-5, rtol=1e-5)

    print("KERNEL_OK")
</pallas_src>

<mosaic_0001>
module attributes {stable_mosaic.version = 11 : i64} {
  func.func @_net2_kernel(%arg0: i32, %arg1: memref<5x5xf32, #tpu.memory_space<vmem>>, %arg2: memref<5x1xf32, #tpu.memory_space<vmem>>, %arg3: memref<5x256xf32, #tpu.memory_space<vmem>>, %arg4: memref<5x256xf32, #tpu.memory_space<vmem>>) attributes {dimension_semantics = [#tpu.dimension_semantics<parallel>], iteration_bounds = array<i64: 4>, scalar_prefetch = 0 : i64, scratch_operands = 0 : i64, tpu.core_type = #tpu.core_type<tc>, window_params = [{pipeline_mode = #tpu.pipeline_mode<synchronous>, transform_indices = @transform_0, window_bounds = array<i64: 5, 5>}, {pipeline_mode = #tpu.pipeline_mode<synchronous>, transform_indices = @transform_1, window_bounds = array<i64: 5, 1>}, {transform_indices = @transform_2, window_bounds = array<i64: 5, 256>}, {transform_indices = @transform_3, window_bounds = array<i64: 5, 256>}]} {
    %c0 = arith.constant 0 : index
    %c0_0 = arith.constant 0 : index
    %0 = vector.load %arg3[%c0, %c0_0] : memref<5x256xf32, #tpu.memory_space<vmem>>, vector<5x256xf32>
    %c0_1 = arith.constant 0 : index
    %c0_2 = arith.constant 0 : index
    %1 = vector.load %arg1[%c0_1, %c0_2] : memref<5x5xf32, #tpu.memory_space<vmem>>, vector<5x5xf32>
    %c0_3 = arith.constant 0 : index
    %c0_4 = arith.constant 0 : index
    %2 = vector.load %arg2[%c0_3, %c0_4] : memref<5x1xf32, #tpu.memory_space<vmem>>, vector<5x1xf32>
    %3 = vector.shape_cast %2 : vector<5x1xf32> to vector<5x1xf32>
    %4 = vector.broadcast %3 : vector<5x1xf32> to vector<5x256xf32>
    %5 = vector.extract_strided_slice %1 {offsets = [0, 0], sizes = [5, 1], strides = [1, 1]} : vector<5x5xf32> to vector<5x1xf32>
    %6 = vector.extract_strided_slice %0 {offsets = [0, 0], sizes = [1, 256], strides = [1, 1]} : vector<5x256xf32> to vector<1x256xf32>
    %7 = vector.broadcast %5 : vector<5x1xf32> to vector<5x256xf32>
    %8 = vector.broadcast %6 : vector<1x256xf32> to vector<5x256xf32>
    %9 = arith.mulf %7, %8 : vector<5x256xf32>
    %10 = arith.addf %4, %9 : vector<5x256xf32>
    %11 = vector.extract_strided_slice %1 {offsets = [0, 1], sizes = [5, 1], strides = [1, 1]} : vector<5x5xf32> to vector<5x1xf32>
    %12 = vector.extract_strided_slice %0 {offsets = [1, 0], sizes = [1, 256], strides = [1, 1]} : vector<5x256xf32> to vector<1x256xf32>
    %13 = vector.broadcast %11 : vector<5x1xf32> to vector<5x256xf32>
    %14 = vector.broadcast %12 : vector<1x256xf32> to vector<5x256xf32>
    %15 = arith.mulf %13, %14 : vector<5x256xf32>
    %16 = arith.addf %10, %15 : vector<5x256xf32>
    %17 = vector.extract_strided_slice %1 {offsets = [0, 2], sizes = [5, 1], strides = [1, 1]} : vector<5x5xf32> to vector<5x1xf32>
    %18 = vector.extract_strided_slice %0 {offsets = [2, 0], sizes = [1, 256], strides = [1, 1]} : vector<5x256xf32> to vector<1x256xf32>
    %19 = vector.broadcast %17 : vector<5x1xf32> to vector<5x256xf32>
    %20 = vector.broadcast %18 : vector<1x256xf32> to vector<5x256xf32>
    %21 = arith.mulf %19, %20 : vector<5x256xf32>
    %22 = arith.addf %16, %21 : vector<5x256xf32>
    %23 = vector.extract_strided_slice %1 {offsets = [0, 3], sizes = [5, 1], strides = [1, 1]} : vector<5x5xf32> to vector<5x1xf32>
    %24 = vector.extract_strided_slice %0 {offsets = [3, 0], sizes = [1, 256], strides = [1, 1]} : vector<5x256xf32> to vector<1x256xf32>
    %25 = vector.broadcast %23 : vector<5x1xf32> to vector<5x256xf32>
    %26 = vector.broadcast %24 : vector<1x256xf32> to vector<5x256xf32>
    %27 = arith.mulf %25, %26 : vector<5x256xf32>
    %28 = arith.addf %22, %27 : vector<5x256xf32>
    %29 = vector.extract_strided_slice %1 {offsets = [0, 4], sizes = [5, 1], strides = [1, 1]} : vector<5x5xf32> to vector<5x1xf32>
    %30 = vector.extract_strided_slice %0 {offsets = [4, 0], sizes = [1, 256], strides = [1, 1]} : vector<5x256xf32> to vector<1x256xf32>
    %31 = vector.broadcast %29 : vector<5x1xf32> to vector<5x256xf32>
    %32 = vector.broadcast %30 : vector<1x256xf32> to vector<5x256xf32>
    %33 = arith.mulf %31, %32 : vector<5x256xf32>
    %34 = arith.addf %28, %33 : vector<5x256xf32>
    %c0_5 = arith.constant 0 : index
    %c0_6 = arith.constant 0 : index
    %35 = vector.load %arg4[%c0_5, %c0_6] : memref<5x256xf32, #tpu.memory_space<vmem>>, vector<5x256xf32>
    tpu.vector_store %arg4[%c0_5, %c0_6], %34 {strides = array<i32>} : memref<5x256xf32, #tpu.memory_space<vmem>>, vector<5x256xf32>,
    return
  }
  func.func @transform_0(%arg0: i32) -> (i32, i32) {
    %c0_i32 = arith.constant 0 : i32
    %c0_i32_0 = arith.constant 0 : i32
    %c0_i32_1 = arith.constant 0 : i32
    return %c0_i32, %c0_i32_0 : i32, i32
  }
  func.func @transform_1(%arg0: i32) -> (i32, i32) {
    %c0_i32 = arith.constant 0 : i32
    %c0_i32_0 = arith.constant 0 : i32
    %c0_i32_1 = arith.constant 0 : i32
    return %c0_i32, %c0_i32_0 : i32, i32
  }
  func.func @transform_2(%arg0: i32) -> (i32, i32) {
    %c0_i32 = arith.constant 0 : i32
    %c0_i32_0 = arith.constant 0 : i32
    return %c0_i32, %arg0 : i32, i32
  }
  func.func @transform_3(%arg0: i32) -> (i32, i32) {
    %c0_i32 = arith.constant 0 : i32
    %c0_i32_0 = arith.constant 0 : i32
    return %c0_i32, %arg0 : i32, i32
  }
}

</mosaic_0001>

<bundles_post_ra>
// kernel: net2_forward_fused.1
= control target key start
LH: loop header
LB: loop body
LE: loop exit
PB: predicated region body
PF: predicated region fallthrough
CT: control target
= control target key end

     0   :  { %8 = vsyncpa [#allocation3], 0  ;;  %s733_s0 = inlined_call_operand.vmem [shape: f32[5,5], index: 0, kind: input, shape index: {}]   ;;  %s734_s1 = inlined_call_operand.vmem [shape: f32[5,1], index: 1, kind: input, shape index: {}]   ;;  %s735_s2 = inlined_call_operand.hbm [shape: f32[5,1000], index: 2, kind: input, shape index: {}]   ;;  %s736_s3 = inlined_call_operand.hbm [shape: f32[5,1000], index: 3, kind: output, shape index: {}]  }
   0x1   :  { %10 = vsyncpa [#allocation3 + $0x1], 0 }
   0x2   :  { %11 = vsyncpa [#allocation4], 0 }
   0x3   :  { %13 = vsyncpa [#allocation4 + $0x1], 0  ;;  %s564_s12 = smov 0   ;;  %s566_s13 = smov 0  }
   0x4   :  { %s568_s14 = smov 0   ;;  %s570_s15 = smov 0  }
   0x5 LB: > { %s585_s16 = sadd.s32 4294967295, %s535_s15   ;;  %s366_s17 = sadd.s32 4294967294, %s535_s15   ;;  %s535_s15 = sphi %s570_s15, %s750_s15   ;;  %s531_s14 = sphi %s568_s14, %s749_s14   ;;  %s527_s13 = sphi %s566_s13, %s748_s13   ;;  %s523_s12 = sphi %s564_s12, %s747_s12  }
   0x6   : > { %s589_s18 = sadd.s32 1, %s535_s15   ;;  %s68_s19 = sadd.s32 1, %s531_s14 }
   0x7   : > { %s65_s20 = ssub.s32 %s535_s15, %s589_s18  ;;  %p75_p0 = scmp.ne.s32.totalorder %s531_s14, %s527_s13 }
   0x8   : > { %p66_p1 = scmp.eq.s32.totalorder %s65_s20, 0  ;;  %p76_p2 = scmp.eq.s32.totalorder %s535_s15, 0 }
   0x9   : > { %p81_p3 = scmp.ne.s32.totalorder %s527_s13, %s523_s12  ;;  %p82_p4 = scmp.eq.s32.totalorder %s585_s16, 0 }
   0xa   : > { %s601_s21 = scalar_select %p66_p1, %s531_s14, %s68_s19  }
   0xb   : > { %p603_p5 = por %p76_p2, %p75_p0  ;;  %p607_p6 = por %p82_p4, %p81_p3 }
   0xc   : > { %p105_p7 = scmp.eq.s32.totalorder %s585_s16, 3  ;;  %p111_p8 = scmp.eq.s32.totalorder %s366_s17, 3 }
   0xd   : > { %p394_p9 = scmp.lt.s32.totalorder %s535_s15, 4  ;;  %s137_s26 = sand.u32 1, %s531_s14  }
   0xe   : > { %p613_p10 = por %p105_p7, %p75_p0  ;;  %p617_p11 = por %p111_p8, %p81_p3 }
   0xf   : > { %s380_s27 = sshll.u32 %s535_s15, 8  ;;  %s369_s28 = sshll.u32 %s137_s26, 4 }
  0x10   : > { %s740_s24 = scalar_select %p613_p10, 1, 0 }
  0x11   : > { %s741_s25 = scalar_select %p617_p11, 1, 0 }
  0x12   : > { %s626_s4 = scalar_lea.hbm %s735_s2, %s380_s27  ;;  %s141_s5 = scalar_lea.vmem [#allocation2], %s369_s28 }
  0x13   : > { %s149_s6 = sshll.u32 %s141_s5, 4  ;;  %p630_p12 = pnand %p394_p9, %p603_p5  ;;  %s634_s6 = int_to_ptr.vmem [resolvable:$true] %s149_s6 }
  0x14   : > { %s138_s8 = scalar_lea.sflag [#allocation3], %s137_s26  ;;  %s439_s9 = scalar_lea.hbm %s626_s4, 256 }
  0x15   : > { %p440_p1 = scmp.ne.s32.totalorder %s626_s4, %s439_s9  ;;  %p441_p2 = pneg %p630_p12 }
  0x16   : > { %s444_s17 = scalar_lea.hbm %s735_s2, 1024  ;;  %p445_p5 = scmp.lt.u32.totalorder %s626_s4, %s735_s2 }
  0x17   : > { %p442_p3 = pnand %p441_p2, %p440_p1  ;;  %p446_p7 = scmp.lt.u32.totalorder %s444_s17, %s439_s9 }
  0x18   : > { %p448_p9 = scmp.lt.u32.totalorder %s439_s9, %s626_s4 }
  0x19   : > { %p443_p4 = pneg %p442_p3  ;;  %p447_p8 = por %p446_p7, %p445_p5 }
  0x1b   : > { %p449_p13 = por %p448_p9, %p447_p8 }
  0x1d   : > { %p450_p0 = pnand %p449_p13, %p443_p4 }
  0x1f   : > { %453 = shalt.err (!%p450_p0)
}
  0x20   : > { %s454_s22 = scalar_lea.vmem %s634_s6, 256  ;;  %s537_s26 = smov [#allocation2]  }
  0x21   : > { %p455_p1 = scmp.ne.s32.totalorder %s634_s6, %s454_s22  ;;  %s459_s27 = sshll.u32 %s537_s26, 4  ;;  %s460_s27 = int_to_ptr.vmem [resolvable:$false] %s459_s27 }
  0x22   : > { %s461_s28 = scalar_lea.vmem %s460_s27, 512  ;;  %p462_p10 = scmp.lt.s32.totalorder %s634_s6, %s460_s27 }
  0x23   : > { %p457_p3 = pnand %p455_p1, %p441_p2  ;;  %p463_p5 = scmp.lt.s32.totalorder %s461_s28, %s454_s22 }
  0x25   : > { %p458_p11 = pneg %p457_p3  ;;  %p464_p7 = por %p463_p5, %p462_p10 }
  0x27   : > { %p465_p8 = pnand %p464_p7, %p458_p11 }
  0x29   : > { %468 = shalt.err (!%p465_p8)
}
  0x2a   : > { %389 = dma.hbm_to_vmem [thread:$0]  (!%p630_p12), %s626_s4, 256, %s634_s6, %s138_s8  }
  0x2b   : > { %p743_p13 = scmp.lt.s32.totalorder %s535_s15, 5  ;;  %p744_p0 = scmp.ge.s32.totalorder %s535_s15, 1 }
  0x2d   : > { %p155_p2 = pnand %p744_p0, %p743_p13 }
  0x2e   : > { %s668_s29 = sand.u32 (!%p155_p2), 1, %s527_s13  }
  0x2f   : > { %158 = sbr.rel (%p155_p2) target bundleno = 214 (0xd6), region = 32  ;;  %s373_s30 = sshll.u32 (!%p155_p2), %s668_s29, 4 }
  0x30   : > { %s161_s5 = scalar_lea.sflag (!%p155_p2), [#allocation3], %s668_s29  ;;  %s164_s7 = scalar_lea.vmem (!%p155_p2), [#allocation2], %s373_s30 }
  0x36   : > { %514 = dma.done.wait (%p607_p6), %s161_s5, 256  }
  0x37   : > { %516 = vsyncadd (%p607_p6), %s161_s5, 4294967040  ;;  %v538_v0 = vmov 0   ;;  %v539_v1 = vmov 1   ;;  %v191_v2 = vld [vmem:[%s733_s0] sm:$0x1f]  ;;  %v540_v4 = vmov 2   ;;  %v203_v7 = vlaneseq }
  0x38   : > { %433 = vset.pattern.permute.xlu0 %v538_v0  ;;  %434 = vset.pattern.permute.xlu1 %v539_v1  ;;  %v192_v3 = vld [vmem:[%s734_s1] sm:$0x1f]  ;;  %v541_v5 = vmov 3   ;;  %v542_v6 = vmov 4   ;;  %v190_v11 = vld [vmem:[%s164_s7 + $0x8] sm:$0x1f] }
  0x39   : > { %200 = vperm.xlu0 %433, %v191_v2   ;;  %216 = vperm.xlu1 %434, %v191_v2   ;;  %v204_v8 = vshrl.u32 %v203_v7, 7  ;;  %v189_v10 = vld [vmem:[%s164_s7] sm:$0x1f]  ;;  %s381_s23 = sshll.u32 %s585_s16, 8  ;;  %s186_s10 = scalar_lea.vmem [#allocation5], %s373_s30 }
  0x3a   : > { %s296_s11 = sshll.u32 %s186_s10, 4  ;;  %s690_s20 = scalar_lea.hbm %s736_s3, %s381_s23  ;;  %s692_s11 = int_to_ptr.vmem [resolvable:$true] %s296_s11 }
  0x3b   : > { %v205_v9 = vsub.s32 0, %v204_v8  ;;  %v221_v12 = vsub.s32 1, %v204_v8  ;;  %v237_v13 = vsub.s32 2, %v204_v8  ;;  %v253_v22 = vsub.s32 3, %v204_v8  ;;  %s282_s16 = scalar_lea.sflag [#allocation4], %s668_s29  ;;  %s469_s22 = scalar_lea.vmem %s692_s11, 256 }
  0x3c   : > { %v269_v25 = vsub.s32 4, %v204_v8  ;;  %p470_p6 = scmp.ne.s32.totalorder %s692_s11, %s469_s22  ;;  %p745_p10 = scmp.ne.s32.totalorder %s740_s24, 0 }
  0x3d   : > { %195 = vperm.xlu0 %433, %v192_v3   ;;  %435 = vset.pattern.permute.xlu1 %v540_v4  ;;  %v206_v14 = vrot.slane %v189_v10, %v205_v9  ;;  %v210_v15 = vrot.slane %v190_v11, %v205_v9  ;;  %v222_v18 = vrot.slane %v189_v10, %v221_v12  ;;  %s543_s26 = smov [#allocation5]  }
  0x3e   : > { %232 = vperm.xlu1 %435, %v191_v2   ;;  %v226_v19 = vrot.slane %v190_v11, %v221_v12  ;;  %v238_v20 = vrot.slane %v189_v10, %v237_v13  ;;  %v242_v21 = vrot.slane %v190_v11, %v237_v13  ;;  %v254_v34 = vrot.slane %v189_v10, %v253_v22  ;;  %p471_p11 = pnand %p470_p6, %p745_p10  ;;  %s473_s27 = sshll.u32 %s543_s26, 4  ;;  %s474_s27 = int_to_ptr.vmem [resolvable:$false] %s473_s27 }
  0x3f   : > { %v258_v35 = vrot.slane %v190_v11, %v253_v22  ;;  %v270_v38 = vrot.slane %v189_v10, %v269_v25  ;;  %v274_v39 = vrot.slane %v190_v11, %v269_v25  ;;  %s475_s28 = scalar_lea.vmem %s474_s27, 512  ;;  %p476_p4 = scmp.lt.s32.totalorder %s692_s11, %s474_s27 }
  0x40   : > { %p472_p12 = pneg %p471_p11  ;;  %p477_p9 = scmp.lt.s32.totalorder %s475_s28, %s469_s22 }
  0x41   : > { %436 = vset.pattern.permute.xlu0 %v541_v5 }
  0x42   : > { %248 = vperm.xlu0 %436, %v191_v2   ;;  %437 = vset.pattern.permute.xlu1 %v542_v6  ;;  %p478_p1 = por %p477_p9, %p476_p4 }
  0x43   : > { %264 = vperm.xlu1 %437, %v191_v2  }
  0x44   : > { %p479_p3 = pnand %p478_p1, %p472_p12 }
  0x46   : > { %438 = vset.pattern.permute.xlu0 %v542_v6 }
  0xb8   : > { %v201_v16 = vpop.permute.xlu0 %200  ;;  %v217_v17 = vpop.permute.xlu1 %216 }
  0xb9   : > { %v211_v23 = vmul.f32 %v206_v14, %v201_v16  ;;  %v212_v24 = vmul.f32 %v210_v15, %v201_v16  ;;  %v227_v27 = vmul.f32 %v222_v18, %v217_v17  ;;  %v228_v28 = vmul.f32 %v226_v19, %v217_v17 }
  0xbc   : > { %v196_v26 = vpop.permute.xlu0 %195 }
  0xbd   : > { %v213_v29 = vadd.f32 %v211_v23, %v196_v26  ;;  %v214_v30 = vadd.f32 %v212_v24, %v196_v26  ;;  %v233_v31 = vpop.permute.xlu1 %232 }
  0xbe   : > { %v243_v32 = vmul.f32 %v238_v20, %v233_v31  ;;  %v244_v33 = vmul.f32 %v242_v21, %v233_v31 }
  0xbf   : > { %v229_v36 = vadd.f32 %v227_v27, %v213_v29  ;;  %v230_v37 = vadd.f32 %v228_v28, %v214_v30 }
  0xc1   : > { %v245_v40 = vadd.f32 %v243_v32, %v229_v36  ;;  %v246_v41 = vadd.f32 %v244_v33, %v230_v37  ;;  %v249_v42 = vpop.permute.xlu0 %248 }
  0xc2   : > { %v259_v43 = vmul.f32 %v254_v34, %v249_v42  ;;  %v260_v44 = vmul.f32 %v258_v35, %v249_v42  ;;  %v265_v45 = vpop.permute.xlu1 %264 }
  0xc3   : > { %v275_v46 = vmul.f32 %v270_v38, %v265_v45  ;;  %v276_v47 = vmul.f32 %v274_v39, %v265_v45 }
  0xc4   : > { %v261_v48 = vadd.f32 %v259_v43, %v245_v40  ;;  %v262_v49 = vadd.f32 %v260_v44, %v246_v41 }
  0xc6   : > { %v277_v50 = vadd.f32 %v275_v46, %v261_v48  ;;  %v278_v51 = vadd.f32 %v276_v47, %v262_v49 }
  0xc8   : > { %279 = vst [vmem:[%s186_s10] sm:$0x1f] %v277_v50  ;;  %280 = vst [vmem:[%s186_s10 + $0x8] sm:$0x1f] %v278_v51 }
  0xc9   : > { %482 = shalt.err (!%p479_p3)
}
  0xca   : > { %s483_s29 = scalar_lea.hbm %s690_s20, 256  ;;  %s487_s7 = scalar_lea.hbm %s736_s3, 1024 }
  0xcb   : > { %p484_p5 = scmp.ne.s32.totalorder %s690_s20, %s483_s29  ;;  %p488_p13 = scmp.lt.u32.totalorder %s690_s20, %s736_s3 }
  0xcc   : > { %p489_p0 = scmp.lt.u32.totalorder %s487_s7, %s483_s29  ;;  %p491_p6 = scmp.lt.u32.totalorder %s483_s29, %s690_s20 }
  0xcd   : > { %p485_p7 = pnand %p484_p5, %p745_p10 }
  0xce   : > { %p490_p2 = por %p489_p0, %p488_p13 }
  0xcf   : > { %p486_p8 = pneg %p485_p7 }
  0xd0   : > { %p492_p11 = por %p491_p6, %p490_p2 }
  0xd2   : > { %p493_p12 = pnand %p492_p11, %p486_p8 }
  0xd4   : > { %496 = shalt.err (!%p493_p12)
}
  0xd5   : > { %384 = dma.vmem_to_hbm [thread:$0]  (%p745_p10), %s692_s11, 256, %s690_s20, %s282_s16  }
  0xd6 PF: > { %p395_p4 = scmp.ge.s32.totalorder %s535_s15, 2  ;;  %s308_s8 = sand.u32 1, %s523_s12  }
  0xd7   : > { %p746_p9 = scmp.ne.s32.totalorder %s741_s25, 0  ;;  %s309_s9 = scalar_lea.sflag [#allocation4], %s308_s8 }
  0xd9   : > { %p391_p1 = pnand %p395_p4, %p746_p9 }
  0xdb   : > { %518 = dma.done.wait (!%p391_p1), %s309_s9, 256  }
  0xdc   : > { %520 = vsyncadd (!%p391_p1), %s309_s9, 4294967040  ;;  %p16_p3 = scmp.ge.s32.totalorder %s589_s18, 6   ;;  %s747_s12 = smov %s527_s13 }
  0xdd   : > { %s748_s13 = smov %s531_s14  ;;  %s749_s14 = smov %s601_s21 }
  0xde   : > { %s750_s15 = smov %s589_s18  ;;  %18 = sbr.rel (!%p16_p3) target bundleno = 5 (0x5), region = 77 }
  0xe5   :  { %314 = vsyncpa [#allocation3], 1 }
  0xe6   :  { %316 = vsyncpa [#allocation3 + $0x1], 1 }
  0xe7   :  { %317 = vsyncpa [#allocation4], 1 }
  0xe8   :  { %319 = vsyncpa [#allocation4 + $0x1], 1 }

</bundles_post_ra>
